<compile_context>
chip_gen: v7x
topology: tpu7x:2x2x1
jax: 0.10.0
libtpu: 0.0.40
codegen_flags: <defaults>
</compile_context>

<pallas_src>
import math
import functools

import jax
import jax.numpy as jnp
from jax import lax
from jax.experimental import pallas as pl
from jax.experimental.pallas import tpu as pltpu


def _harmonic_kernel(fuw_ref, noise_ref, htab_ref, wcum_ref, wnn_ref, wtot_ref,
                     o_ref, carry_ref, *, num_harmonics, noise_scale):
    c = pl.program_id(1)

    # Reset the running-phase carry at the start of each batch row.
    @pl.when(c == 0)
    def _():
        carry_ref[...] = jnp.zeros_like(carry_ref)

    win = fuw_ref[0, 0]                  # (2, Lw): row 0 = f0 frames, row 1 = uv frames
    f0w = win[0:1, :]                    # (1, Lw)
    uvw = win[1:2, :]                    # (1, Lw)

    carry = carry_ref[...]               # (1, 1) phase (mod 1) carried from prev chunk

    # Fused linear-upsample + within-chunk prefix sum (already scaled by 1/sample_rate).
    # HIGHEST precision only on the f0 -> phase path.
    s_all = carry + jnp.dot(f0w, wcum_ref[...],
                            preferred_element_type=jnp.float32,
                            precision=lax.Precision.HIGHEST)      # (1, Tc)

    # Nearest-neighbor upsample of uv: 0/1 selection matmul, exact at DEFAULT precision.
    vm = jnp.dot(uvw, wnn_ref[...], preferred_element_type=jnp.float32)  # (1, Tc)

    # Update the carry with frac(total phase); exact because harmonics are integer
    # multiples, and keeps the carried value small for f32 precision on long signals.
    total = carry + jnp.sum(f0w * wtot_ref[...], axis=1, keepdims=True)  # (1, 1)
    carry_ref[...] = total - jnp.floor(total)

    # Harmonic bank via angle-addition recurrence:
    #   sin((h+1)*theta + 2*pi*phi_h) = s_{h+1}*cos(2*pi*phi_h) + c_{h+1}*sin(2*pi*phi_h)
    # htab rows: [wn_h, wn_h*cos(2*pi*phi_h), wn_h*sin(2*pi*phi_h)]
    theta = (2.0 * math.pi) * (s_all - jnp.floor(s_all))
    s1 = jnp.sin(theta)
    c1 = jnp.cos(theta)
    sh = s1
    ch = c1
    sin_w = sh * htab_ref[0:1, 1:2] + ch * htab_ref[0:1, 2:3]             # (1, Tc)
    noise_w = noise_ref[0, 0:1, :].astype(jnp.float32) * htab_ref[0:1, 0:1]
    for h in range(1, num_harmonics):
        sh, ch = sh * c1 + ch * s1, ch * c1 - sh * s1
        sin_w = sin_w + sh * htab_ref[h:h + 1, 1:2] + ch * htab_ref[h:h + 1, 2:3]
        noise_w = noise_w + (noise_ref[0, h:h + 1, :].astype(jnp.float32)
                             * htab_ref[h:h + 1, 0:1])

    # Fused voiced/unvoiced mix (keeps the module's double-noise / double-vm semantics).
    gain = (2.0 * noise_scale) * vm + 0.333 * (1.0 - vm)
    o_ref[0] = vm * vm * sin_w + gain * noise_w


def _pick_chunk_size(T, frame_size, target=2048):
    """Largest lane-dense (multiple of 128 and frame_size) chunk <= target dividing T."""
    base = frame_size * 128 // math.gcd(frame_size, 128)
    if base > T or T % base != 0:
        return T            # fall back: single chunk covers everything
    tc = base
    while tc * 2 <= min(target, T) and T % (tc * 2) == 0:
        tc *= 2
    return tc


def harmonic_oscillator(f0, uv, noise, phi, weights, *,
                        sample_rate, frame_size, noise_scale, chunk_target=2048):
    N, _, L = f0.shape
    H = noise.shape[1]
    T = L * frame_size
    assert noise.shape == (N, H, T)

    TC = _pick_chunk_size(T, frame_size, chunk_target)
    C = T // TC
    LC = TC // frame_size
    Lw = LC + 2          # chunk frame window: 1 frame halo on each side

    # ---- batch-invariant constants (layout / parameter preprocessing) ----
    s = float(frame_size)
    j = jnp.arange(TC, dtype=jnp.float32)
    a = (j + 0.5) / s - 0.5                       # source coord rel. to chunk (can be <0)
    p = jnp.floor(a)                              # in [-1, LC-1]
    lam = a - p
    m = jnp.arange(Lw, dtype=jnp.float32)[:, None]
    # lerp weights of padded-local frame m for sample j (edge padding handles clamping)
    wlerp = ((m == (p + 1.0)[None, :]) * (1.0 - lam)[None, :]
             + (m == (p + 2.0)[None, :]) * lam[None, :])                    # (Lw, TC)
    wcum = jnp.cumsum(wlerp, axis=1) * (1.0 / float(sample_rate))           # (Lw, TC)
    wtot = wcum[:, -1:].T                                                   # (1, Lw)
    nn_m = jnp.arange(TC) // frame_size + 1
    wnn = (jnp.arange(Lw)[:, None] == nn_m[None, :]).astype(jnp.float32)    # (Lw, TC)

    # Per-harmonic table: [wn, wn*cos(2*pi*phi), wn*sin(2*pi*phi)] (weight norm hoisted).
    w = weights.reshape(H).astype(jnp.float32)
    wn = w / jnp.maximum(jnp.sqrt(jnp.sum(w * w)), 1e-12)
    ph = phi.reshape(H).astype(jnp.float32)
    htab = jnp.stack([wn,
                      wn * jnp.cos(2.0 * math.pi * ph),
                      wn * jnp.sin(2.0 * math.pi * ph)], axis=1)            # (H, 3)

    # Edge-padded frame data, pre-windowed per chunk: (N, C, 2, Lw), row0=f0, row1=uv.
    f0p = jnp.concatenate([f0[:, :, :1], f0, f0[:, :, -1:]], axis=2)
    uvp = jnp.concatenate([uv[:, :, :1], uv, uv[:, :, -1:]], axis=2)
    fu = jnp.concatenate([f0p, uvp], axis=1).astype(jnp.float32)            # (N, 2, L+2)
    idx = (jnp.arange(C) * LC)[:, None] + jnp.arange(Lw)[None, :]           # (C, Lw)
    fuw = jnp.transpose(fu[:, :, idx], (0, 2, 1, 3))                        # (N, C, 2, Lw)

    noise_bf16 = noise.astype(jnp.bfloat16)   # halve the only per-step HBM stream

    kernel = functools.partial(_harmonic_kernel,
                               num_harmonics=H,
                               noise_scale=float(noise_scale))

    return pl.pallas_call(
        kernel,
        out_shape=jax.ShapeDtypeStruct((N, 1, T), jnp.float32),
        grid_spec=pltpu.PrefetchScalarGridSpec(
            num_scalar_prefetch=0,
            grid=(N, C),
            in_specs=[
                pl.BlockSpec((1, 1, 2, Lw), lambda n, c: (n, c, 0, 0)),   # frame windows
                pl.BlockSpec((1, H, TC), lambda n, c: (n, 0, c)),         # noise (bf16)
                pl.BlockSpec((H, 3), lambda n, c: (0, 0)),                # harmonic table
                pl.BlockSpec((Lw, TC), lambda n, c: (0, 0)),              # lerp+cumsum mat
                pl.BlockSpec((Lw, TC), lambda n, c: (0, 0)),              # nearest mat
                pl.BlockSpec((1, Lw), lambda n, c: (0, 0)),               # chunk totals
            ],
            out_specs=pl.BlockSpec((1, 1, TC), lambda n, c: (n, 0, c)),
            scratch_shapes=[pltpu.VMEM((1, 1), jnp.float32)],             # phase carry
        ),
        compiler_params=pltpu.CompilerParams(
            dimension_semantics=("parallel", "arbitrary")),
    )(fuw, noise_bf16, htab, wcum, wnn, wtot)


def _reference(f0, uv, noise, phi, weights, *, sample_rate, frame_size, noise_scale):
    """Pure-JAX reference mirroring the PyTorch forward."""
    N, _, L = f0.shape
    H = noise.shape[1]
    T = L * frame_size
    t = jnp.arange(T, dtype=jnp.float32)
    src = jnp.maximum((t + 0.5) / frame_size - 0.5, 0.0)
    i0 = jnp.clip(jnp.floor(src).astype(jnp.int32), 0, L - 1)
    i1 = jnp.minimum(i0 + 1, L - 1)
    lam = src - i0.astype(jnp.float32)
    f0_up = f0[:, :, i0] * (1.0 - lam) + f0[:, :, i1] * lam
    vm = uv[:, :, jnp.arange(T) // frame_size]
    mul = (jnp.arange(H, dtype=jnp.float32) + 1.0).reshape(1, H, 1)
    fs = f0_up * mul
    integrated = jnp.cumsum(fs / sample_rate, axis=2)
    x = integrated + phi
    rad = 2.0 * math.pi * (x - jnp.floor(x))
    harmonics = jnp.sin(rad) * vm + noise * noise_scale
    voiced = harmonics + noise * noise_scale
    unvoiced = noise * 0.333
    source = voiced * vm + unvoiced * (1.0 - vm)
    wn = weights / jnp.maximum(
        jnp.sqrt(jnp.sum(weights * weights, axis=1, keepdims=True)), 1e-12)
    return jnp.sum(source * wn, axis=1, keepdims=True)


if __name__ == "__main__":
    sample_rate = 24000
    frame_size = 16
    num_harmonics = 8
    noise_scale = 0.03

    N, L = 2, 8
    T = L * frame_size  # 128

    key = jax.random.PRNGKey(0)
    k1, k2, k3, k4 = jax.random.split(key, 4)
    f0 = jax.random.uniform(k1, (N, 1, L), minval=100.0, maxval=400.0,
                            dtype=jnp.float32)
    uv = (jax.random.uniform(k2, (N, 1, L)) > 0.3).astype(jnp.float32)
    # noise is streamed to the kernel in bf16; use the bf16-rounded values everywhere
    # so the reference sees the identical dither.
    noise = jax.random.normal(k3, (N, num_harmonics, T), dtype=jnp.float32)
    noise = noise.astype(jnp.bfloat16).astype(jnp.float32)
    phi = jax.random.uniform(k4, (1, num_harmonics, 1), dtype=jnp.float32)
    # nn.Parameter(torch.ones(1, num_harmonics, 1)) -> deterministic init
    weights = jnp.ones((1, num_harmonics, 1), dtype=jnp.float32)

    out = harmonic_oscillator(f0, uv, noise, phi, weights,
                              sample_rate=sample_rate,
                              frame_size=frame_size,
                              noise_scale=noise_scale)
    out = jax.block_until_ready(out)
    assert out.shape == (N, 1, T), out.shape

    ref = _reference(f0, uv, noise, phi, weights,
                     sample_rate=sample_rate, frame_size=frame_size,
                     noise_scale=noise_scale)
    assert jnp.allclose(out, ref, atol=5e-3, rtol=1e-3), \
        f"max abs err = {jnp.max(jnp.abs(out - ref))}"

    print("KERNEL_OK")
</pallas_src>

<mosaic_0001>
module attributes {stable_mosaic.version = 11 : i64} {
  func.func @_harmonic_kernel(%arg0: i32, %arg1: i32, %arg2: memref<1x1x2x10xf32, #tpu.memory_space<vmem>>, %arg3: memref<1x8x128xbf16, #tpu.memory_space<vmem>>, %arg4: memref<8x3xf32, #tpu.memory_space<vmem>>, %arg5: memref<10x128xf32, #tpu.memory_space<vmem>>, %arg6: memref<10x128xf32, #tpu.memory_space<vmem>>, %arg7: memref<1x10xf32, #tpu.memory_space<vmem>>, %arg8: memref<1x1x128xf32, #tpu.memory_space<vmem>>, %arg9: memref<1x1xf32, #tpu.memory_space<vmem>>) attributes {dimension_semantics = [#tpu.dimension_semantics<parallel>, #tpu.dimension_semantics<arbitrary>], iteration_bounds = array<i64: 2, 1>, scalar_prefetch = 0 : i64, scratch_operands = 1 : i64, tpu.core_type = #tpu.core_type<tc>, window_params = [{transform_indices = @transform_0, window_bounds = array<i64: 1, 1, 2, 10>}, {transform_indices = @transform_1, window_bounds = array<i64: 1, 8, 128>}, {pipeline_mode = #tpu.pipeline_mode<synchronous>, transform_indices = @transform_2, window_bounds = array<i64: 8, 3>}, {pipeline_mode = #tpu.pipeline_mode<synchronous>, transform_indices = @transform_3, window_bounds = array<i64: 10, 128>}, {pipeline_mode = #tpu.pipeline_mode<synchronous>, transform_indices = @transform_4, window_bounds = array<i64: 10, 128>}, {pipeline_mode = #tpu.pipeline_mode<synchronous>, transform_indices = @transform_5, window_bounds = array<i64: 1, 10>}, {transform_indices = @transform_6, window_bounds = array<i64: 1, 1, 128>}]} {
    %c0_i32 = arith.constant 0 : i32
    %0 = arith.cmpi eq, %arg1, %c0_i32 : i32
    %1 = arith.extui %0 : i1 to i32
    %c0_i32_0 = arith.constant 0 : i32
    %2 = arith.cmpi ne, %1, %c0_i32_0 : i32
    scf.if %2 {
      %cst_88 = arith.constant 0.000000e+00 : f32
      %202 = vector.broadcast %cst_88 : f32 to vector<1x1xf32>
      %c0_89 = arith.constant 0 : index
      %c0_90 = arith.constant 0 : index
      %203 = vector.load %arg9[%c0_89, %c0_90] : memref<1x1xf32, #tpu.memory_space<vmem>>, vector<1x1xf32>
      tpu.vector_store %arg9[%c0_89, %c0_90], %202 {strides = array<i32>} : memref<1x1xf32, #tpu.memory_space<vmem>>, vector<1x1xf32>,
    } else {
    }
    %c0 = arith.constant 0 : index
    %c0_1 = arith.constant 0 : index
    %c0_2 = arith.constant 0 : index
    %c0_3 = arith.constant 0 : index
    %3 = vector.load %arg2[%c0, %c0_1, %c0_2, %c0_3] : memref<1x1x2x10xf32, #tpu.memory_space<vmem>>, vector<1x1x2x10xf32>
    %4 = vector.shape_cast %3 : vector<1x1x2x10xf32> to vector<2x10xf32>
    %5 = vector.extract_strided_slice %4 {offsets = [0, 0], sizes = [1, 10], strides = [1, 1]} : vector<2x10xf32> to vector<1x10xf32>
    %6 = vector.extract_strided_slice %4 {offsets = [1, 0], sizes = [1, 10], strides = [1, 1]} : vector<2x10xf32> to vector<1x10xf32>
    %c0_4 = arith.constant 0 : index
    %c0_5 = arith.constant 0 : index
    %7 = vector.load %arg9[%c0_4, %c0_5] : memref<1x1xf32, #tpu.memory_space<vmem>>, vector<1x1xf32>
    %c0_6 = arith.constant 0 : index
    %c0_7 = arith.constant 0 : index
    %8 = vector.load %arg5[%c0_6, %c0_7] : memref<10x128xf32, #tpu.memory_space<vmem>>, vector<10x128xf32>
    %cst = arith.constant dense<0.000000e+00> : vector<1x128xf32>
    %9 = tpu.matmul %5, %8, %cst {dimension_numbers = #tpu.dot_dimension_numbers<[1], [0], [0], [1], [0, 0, 1, 1], [], []>, precision = #tpu.contract_precision<fp32>} : vector<1x10xf32>, vector<10x128xf32>, vector<1x128xf32> -> vector<1x128xf32>
    %10 = vector.broadcast %7 : vector<1x1xf32> to vector<1x128xf32>
    %11 = arith.addf %10, %9 : vector<1x128xf32>
    %c0_8 = arith.constant 0 : index
    %c0_9 = arith.constant 0 : index
    %12 = vector.load %arg6[%c0_8, %c0_9] : memref<10x128xf32, #tpu.memory_space<vmem>>, vector<10x128xf32>
    %cst_10 = arith.constant dense<0.000000e+00> : vector<1x128xf32>
    %13 = tpu.matmul %6, %12, %cst_10 {dimension_numbers = #tpu.dot_dimension_numbers<[1], [0], [0], [1], [0, 0, 1, 1], [], []>} : vector<1x10xf32>, vector<10x128xf32>, vector<1x128xf32> -> vector<1x128xf32>
    %c0_11 = arith.constant 0 : index
    %c0_12 = arith.constant 0 : index
    %14 = vector.load %arg7[%c0_11, %c0_12] : memref<1x10xf32, #tpu.memory_space<vmem>>, vector<1x10xf32>
    %15 = arith.mulf %5, %14 : vector<1x10xf32>
    %cst_13 = arith.constant dense<0.000000e+00> : vector<1xf32>
    %16 = vector.multi_reduction <add>, %15, %cst_13 [1] : vector<1x10xf32> to vector<1xf32>
    %17 = vector.shape_cast %16 : vector<1xf32> to vector<1x1xf32>
    %18 = arith.addf %7, %17 : vector<1x1xf32>
    %19 = math.floor %18 : vector<1x1xf32>
    %20 = arith.subf %18, %19 : vector<1x1xf32>
    %c0_14 = arith.constant 0 : index
    %c0_15 = arith.constant 0 : index
    %21 = vector.load %arg9[%c0_14, %c0_15] : memref<1x1xf32, #tpu.memory_space<vmem>>, vector<1x1xf32>
    tpu.vector_store %arg9[%c0_14, %c0_15], %20 {strides = array<i32>} : memref<1x1xf32, #tpu.memory_space<vmem>>, vector<1x1xf32>,
    %22 = math.floor %11 : vector<1x128xf32>
    %23 = arith.subf %11, %22 : vector<1x128xf32>
    %cst_16 = arith.constant 6.28318548 : f32
    %24 = vector.broadcast %cst_16 : f32 to vector<1x128xf32>
    %25 = arith.mulf %24, %23 : vector<1x128xf32>
    %26 = math.sin %25 : vector<1x128xf32>
    %27 = math.cos %25 : vector<1x128xf32>
    %c0_17 = arith.constant 0 : index
    %c1 = arith.constant 1 : index
    %28 = vector.load %arg4[%c0_17, %c1] : memref<8x3xf32, #tpu.memory_space<vmem>>, vector<1x1xf32>
    %29 = vector.broadcast %28 : vector<1x1xf32> to vector<1x128xf32>
    %30 = arith.mulf %26, %29 : vector<1x128xf32>
    %c0_18 = arith.constant 0 : index
    %c2 = arith.constant 2 : index
    %31 = vector.load %arg4[%c0_18, %c2] : memref<8x3xf32, #tpu.memory_space<vmem>>, vector<1x1xf32>
    %32 = vector.broadcast %31 : vector<1x1xf32> to vector<1x128xf32>
    %33 = arith.mulf %27, %32 : vector<1x128xf32>
    %34 = arith.addf %30, %33 : vector<1x128xf32>
    %c0_19 = arith.constant 0 : index
    %c0_20 = arith.constant 0 : index
    %c0_21 = arith.constant 0 : index
    %35 = vector.load %arg3[%c0_19, %c0_20, %c0_21] : memref<1x8x128xbf16, #tpu.memory_space<vmem>>, vector<1x1x128xbf16>
    %36 = vector.shape_cast %35 : vector<1x1x128xbf16> to vector<1x128xbf16>
    %37 = arith.extf %36 : vector<1x128xbf16> to vector<1x128xf32>
    %c0_22 = arith.constant 0 : index
    %c0_23 = arith.constant 0 : index
    %38 = vector.load %arg4[%c0_22, %c0_23] : memref<8x3xf32, #tpu.memory_space<vmem>>, vector<1x1xf32>
    %39 = vector.broadcast %38 : vector<1x1xf32> to vector<1x128xf32>
    %40 = arith.mulf %37, %39 : vector<1x128xf32>
    %41 = arith.mulf %26, %27 : vector<1x128xf32>
    %42 = arith.mulf %27, %26 : vector<1x128xf32>
    %43 = arith.addf %41, %42 : vector<1x128xf32>
    %44 = arith.mulf %27, %27 : vector<1x128xf32>
    %45 = arith.mulf %26, %26 : vector<1x128xf32>
    %46 = arith.subf %44, %45 : vector<1x128xf32>
    %c1_24 = arith.constant 1 : index
    %c1_25 = arith.constant 1 : index
    %47 = vector.load %arg4[%c1_24, %c1_25] : memref<8x3xf32, #tpu.memory_space<vmem>>, vector<1x1xf32>
    %48 = vector.broadcast %47 : vector<1x1xf32> to vector<1x128xf32>
    %49 = arith.mulf %43, %48 : vector<1x128xf32>
    %50 = arith.addf %34, %49 : vector<1x128xf32>
    %c1_26 = arith.constant 1 : index
    %c2_27 = arith.constant 2 : index
    %51 = vector.load %arg4[%c1_26, %c2_27] : memref<8x3xf32, #tpu.memory_space<vmem>>, vector<1x1xf32>
    %52 = vector.broadcast %51 : vector<1x1xf32> to vector<1x128xf32>
    %53 = arith.mulf %46, %52 : vector<1x128xf32>
    %54 = arith.addf %50, %53 : vector<1x128xf32>
    %c0_28 = arith.constant 0 : index
    %c1_29 = arith.constant 1 : index
    %c0_30 = arith.constant 0 : index
    %55 = vector.load %arg3[%c0_28, %c1_29, %c0_30] : memref<1x8x128xbf16, #tpu.memory_space<vmem>>, vector<1x1x128xbf16>
    %56 = vector.shape_cast %55 : vector<1x1x128xbf16> to vector<1x128xbf16>
    %57 = arith.extf %56 : vector<1x128xbf16> to vector<1x128xf32>
    %c1_31 = arith.constant 1 : index
    %c0_32 = arith.constant 0 : index
    %58 = vector.load %arg4[%c1_31, %c0_32] : memref<8x3xf32, #tpu.memory_space<vmem>>, vector<1x1xf32>
    %59 = vector.broadcast %58 : vector<1x1xf32> to vector<1x128xf32>
    %60 = arith.mulf %57, %59 : vector<1x128xf32>
    %61 = arith.addf %40, %60 : vector<1x128xf32>
    %62 = arith.mulf %43, %27 : vector<1x128xf32>
    %63 = arith.mulf %46, %26 : vector<1x128xf32>
    %64 = arith.addf %62, %63 : vector<1x128xf32>
    %65 = arith.mulf %46, %27 : vector<1x128xf32>
    %66 = arith.mulf %43, %26 : vector<1x128xf32>
    %67 = arith.subf %65, %66 : vector<1x128xf32>
    %c2_33 = arith.constant 2 : index
    %c1_34 = arith.constant 1 : index
    %68 = vector.load %arg4[%c2_33, %c1_34] : memref<8x3xf32, #tpu.memory_space<vmem>>, vector<1x1xf32>
    %69 = vector.broadcast %68 : vector<1x1xf32> to vector<1x128xf32>
    %70 = arith.mulf %64, %69 : vector<1x128xf32>
    %71 = arith.addf %54, %70 : vector<1x128xf32>
    %c2_35 = arith.constant 2 : index
    %c2_36 = arith.constant 2 : index
    %72 = vector.load %arg4[%c2_35, %c2_36] : memref<8x3xf32, #tpu.memory_space<vmem>>, vector<1x1xf32>
    %73 = vector.broadcast %72 : vector<1x1xf32> to vector<1x128xf32>
    %74 = arith.mulf %67, %73 : vector<1x128xf32>
    %75 = arith.addf %71, %74 : vector<1x128xf32>
    %c0_37 = arith.constant 0 : index
    %c2_38 = arith.constant 2 : index
    %c0_39 = arith.constant 0 : index
    %76 = vector.load %arg3[%c0_37, %c2_38, %c0_39] : memref<1x8x128xbf16, #tpu.memory_space<vmem>>, vector<1x1x128xbf16>
    %77 = vector.shape_cast %76 : vector<1x1x128xbf16> to vector<1x128xbf16>
    %78 = arith.extf %77 : vector<1x128xbf16> to vector<1x128xf32>
    %c2_40 = arith.constant 2 : index
    %c0_41 = arith.constant 0 : index
    %79 = vector.load %arg4[%c2_40, %c0_41] : memref<8x3xf32, #tpu.memory_space<vmem>>, vector<1x1xf32>
    %80 = vector.broadcast %79 : vector<1x1xf32> to vector<1x128xf32>
    %81 = arith.mulf %78, %80 : vector<1x128xf32>
    %82 = arith.addf %61, %81 : vector<1x128xf32>
    %83 = arith.mulf %64, %27 : vector<1x128xf32>
    %84 = arith.mulf %67, %26 : vector<1x128xf32>
    %85 = arith.addf %83, %84 : vector<1x128xf32>
    %86 = arith.mulf %67, %27 : vector<1x128xf32>
    %87 = arith.mulf %64, %26 : vector<1x128xf32>
    %88 = arith.subf %86, %87 : vector<1x128xf32>
    %c3 = arith.constant 3 : index
    %c1_42 = arith.constant 1 : index
    %89 = vector.load %arg4[%c3, %c1_42] : memref<8x3xf32, #tpu.memory_space<vmem>>, vector<1x1xf32>
    %90 = vector.broadcast %89 : vector<1x1xf32> to vector<1x128xf32>
    %91 = arith.mulf %85, %90 : vector<1x128xf32>
    %92 = arith.addf %75, %91 : vector<1x128xf32>
    %c3_43 = arith.constant 3 : index
    %c2_44 = arith.constant 2 : index
    %93 = vector.load %arg4[%c3_43, %c2_44] : memref<8x3xf32, #tpu.memory_space<vmem>>, vector<1x1xf32>
    %94 = vector.broadcast %93 : vector<1x1xf32> to vector<1x128xf32>
    %95 = arith.mulf %88, %94 : vector<1x128xf32>
    %96 = arith.addf %92, %95 : vector<1x128xf32>
    %c0_45 = arith.constant 0 : index
    %c3_46 = arith.constant 3 : index
    %c0_47 = arith.constant 0 : index
    %97 = vector.load %arg3[%c0_45, %c3_46, %c0_47] : memref<1x8x128xbf16, #tpu.memory_space<vmem>>, vector<1x1x128xbf16>
    %98 = vector.shape_cast %97 : vector<1x1x128xbf16> to vector<1x128xbf16>
    %99 = arith.extf %98 : vector<1x128xbf16> to vector<1x128xf32>
    %c3_48 = arith.constant 3 : index
    %c0_49 = arith.constant 0 : index
    %100 = vector.load %arg4[%c3_48, %c0_49] : memref<8x3xf32, #tpu.memory_space<vmem>>, vector<1x1xf32>
    %101 = vector.broadcast %100 : vector<1x1xf32> to vector<1x128xf32>
    %102 = arith.mulf %99, %101 : vector<1x128xf32>
    %103 = arith.addf %82, %102 : vector<1x128xf32>
    %104 = arith.mulf %85, %27 : vector<1x128xf32>
    %105 = arith.mulf %88, %26 : vector<1x128xf32>
    %106 = arith.addf %104, %105 : vector<1x128xf32>
    %107 = arith.mulf %88, %27 : vector<1x128xf32>
    %108 = arith.mulf %85, %26 : vector<1x128xf32>
    %109 = arith.subf %107, %108 : vector<1x128xf32>
    %c4 = arith.constant 4 : index
    %c1_50 = arith.constant 1 : index
    %110 = vector.load %arg4[%c4, %c1_50] : memref<8x3xf32, #tpu.memory_space<vmem>>, vector<1x1xf32>
    %111 = vector.broadcast %110 : vector<1x1xf32> to vector<1x128xf32>
    %112 = arith.mulf %106, %111 : vector<1x128xf32>
    %113 = arith.addf %96, %112 : vector<1x128xf32>
    %c4_51 = arith.constant 4 : index
    %c2_52 = arith.constant 2 : index
    %114 = vector.load %arg4[%c4_51, %c2_52] : memref<8x3xf32, #tpu.memory_space<vmem>>, vector<1x1xf32>
    %115 = vector.broadcast %114 : vector<1x1xf32> to vector<1x128xf32>
    %116 = arith.mulf %109, %115 : vector<1x128xf32>
    %117 = arith.addf %113, %116 : vector<1x128xf32>
    %c0_53 = arith.constant 0 : index
    %c4_54 = arith.constant 4 : index
    %c0_55 = arith.constant 0 : index
    %118 = vector.load %arg3[%c0_53, %c4_54, %c0_55] : memref<1x8x128xbf16, #tpu.memory_space<vmem>>, vector<1x1x128xbf16>
    %119 = vector.shape_cast %118 : vector<1x1x128xbf16> to vector<1x128xbf16>
    %120 = arith.extf %119 : vector<1x128xbf16> to vector<1x128xf32>
    %c4_56 = arith.constant 4 : index
    %c0_57 = arith.constant 0 : index
    %121 = vector.load %arg4[%c4_56, %c0_57] : memref<8x3xf32, #tpu.memory_space<vmem>>, vector<1x1xf32>
    %122 = vector.broadcast %121 : vector<1x1xf32> to vector<1x128xf32>
    %123 = arith.mulf %120, %122 : vector<1x128xf32>
    %124 = arith.addf %103, %123 : vector<1x128xf32>
    %125 = arith.mulf %106, %27 : vector<1x128xf32>
    %126 = arith.mulf %109, %26 : vector<1x128xf32>
    %127 = arith.addf %125, %126 : vector<1x128xf32>
    %128 = arith.mulf %109, %27 : vector<1x128xf32>
    %129 = arith.mulf %106, %26 : vector<1x128xf32>
    %130 = arith.subf %128, %129 : vector<1x128xf32>
    %c5 = arith.constant 5 : index
    %c1_58 = arith.constant 1 : index
    %131 = vector.load %arg4[%c5, %c1_58] : memref<8x3xf32, #tpu.memory_space<vmem>>, vector<1x1xf32>
    %132 = vector.broadcast %131 : vector<1x1xf32> to vector<1x128xf32>
    %133 = arith.mulf %127, %132 : vector<1x128xf32>
    %134 = arith.addf %117, %133 : vector<1x128xf32>
    %c5_59 = arith.constant 5 : index
    %c2_60 = arith.constant 2 : index
    %135 = vector.load %arg4[%c5_59, %c2_60] : memref<8x3xf32, #tpu.memory_space<vmem>>, vector<1x1xf32>
    %136 = vector.broadcast %135 : vector<1x1xf32> to vector<1x128xf32>
    %137 = arith.mulf %130, %136 : vector<1x128xf32>
    %138 = arith.addf %134, %137 : vector<1x128xf32>
    %c0_61 = arith.constant 0 : index
    %c5_62 = arith.constant 5 : index
    %c0_63 = arith.constant 0 : index
    %139 = vector.load %arg3[%c0_61, %c5_62, %c0_63] : memref<1x8x128xbf16, #tpu.memory_space<vmem>>, vector<1x1x128xbf16>
    %140 = vector.shape_cast %139 : vector<1x1x128xbf16> to vector<1x128xbf16>
    %141 = arith.extf %140 : vector<1x128xbf16> to vector<1x128xf32>
    %c5_64 = arith.constant 5 : index
    %c0_65 = arith.constant 0 : index
    %142 = vector.load %arg4[%c5_64, %c0_65] : memref<8x3xf32, #tpu.memory_space<vmem>>, vector<1x1xf32>
    %143 = vector.broadcast %142 : vector<1x1xf32> to vector<1x128xf32>
    %144 = arith.mulf %141, %143 : vector<1x128xf32>
    %145 = arith.addf %124, %144 : vector<1x128xf32>
    %146 = arith.mulf %127, %27 : vector<1x128xf32>
    %147 = arith.mulf %130, %26 : vector<1x128xf32>
    %148 = arith.addf %146, %147 : vector<1x128xf32>
    %149 = arith.mulf %130, %27 : vector<1x128xf32>
    %150 = arith.mulf %127, %26 : vector<1x128xf32>
    %151 = arith.subf %149, %150 : vector<1x128xf32>
    %c6 = arith.constant 6 : index
    %c1_66 = arith.constant 1 : index
    %152 = vector.load %arg4[%c6, %c1_66] : memref<8x3xf32, #tpu.memory_space<vmem>>, vector<1x1xf32>
    %153 = vector.broadcast %152 : vector<1x1xf32> to vector<1x128xf32>
    %154 = arith.mulf %148, %153 : vector<1x128xf32>
    %155 = arith.addf %138, %154 : vector<1x128xf32>
    %c6_67 = arith.constant 6 : index
    %c2_68 = arith.constant 2 : index
    %156 = vector.load %arg4[%c6_67, %c2_68] : memref<8x3xf32, #tpu.memory_space<vmem>>, vector<1x1xf32>
    %157 = vector.broadcast %156 : vector<1x1xf32> to vector<1x128xf32>
    %158 = arith.mulf %151, %157 : vector<1x128xf32>
    %159 = arith.addf %155, %158 : vector<1x128xf32>
    %c0_69 = arith.constant 0 : index
    %c6_70 = arith.constant 6 : index
    %c0_71 = arith.constant 0 : index
    %160 = vector.load %arg3[%c0_69, %c6_70, %c0_71] : memref<1x8x128xbf16, #tpu.memory_space<vmem>>, vector<1x1x128xbf16>
    %161 = vector.shape_cast %160 : vector<1x1x128xbf16> to vector<1x128xbf16>
    %162 = arith.extf %161 : vector<1x128xbf16> to vector<1x128xf32>
    %c6_72 = arith.constant 6 : index
    %c0_73 = arith.constant 0 : index
    %163 = vector.load %arg4[%c6_72, %c0_73] : memref<8x3xf32, #tpu.memory_space<vmem>>, vector<1x1xf32>
    %164 = vector.broadcast %163 : vector<1x1xf32> to vector<1x128xf32>
    %165 = arith.mulf %162, %164 : vector<1x128xf32>
    %166 = arith.addf %145, %165 : vector<1x128xf32>
    %167 = arith.mulf %148, %27 : vector<1x128xf32>
    %168 = arith.mulf %151, %26 : vector<1x128xf32>
    %169 = arith.addf %167, %168 : vector<1x128xf32>
    %170 = arith.mulf %151, %27 : vector<1x128xf32>
    %171 = arith.mulf %148, %26 : vector<1x128xf32>
    %172 = arith.subf %170, %171 : vector<1x128xf32>
    %c7 = arith.constant 7 : index
    %c1_74 = arith.constant 1 : index
    %173 = vector.load %arg4[%c7, %c1_74] : memref<8x3xf32, #tpu.memory_space<vmem>>, vector<1x1xf32>
    %174 = vector.broadcast %173 : vector<1x1xf32> to vector<1x128xf32>
    %175 = arith.mulf %169, %174 : vector<1x128xf32>
    %176 = arith.addf %159, %175 : vector<1x128xf32>
    %c7_75 = arith.constant 7 : index
    %c2_76 = arith.constant 2 : index
    %177 = vector.load %arg4[%c7_75, %c2_76] : memref<8x3xf32, #tpu.memory_space<vmem>>, vector<1x1xf32>
    %178 = vector.broadcast %177 : vector<1x1xf32> to vector<1x128xf32>
    %179 = arith.mulf %172, %178 : vector<1x128xf32>
    %180 = arith.addf %176, %179 : vector<1x128xf32>
    %c0_77 = arith.constant 0 : index
    %c7_78 = arith.constant 7 : index
    %c0_79 = arith.constant 0 : index
    %181 = vector.load %arg3[%c0_77, %c7_78, %c0_79] : memref<1x8x128xbf16, #tpu.memory_space<vmem>>, vector<1x1x128xbf16>
    %182 = vector.shape_cast %181 : vector<1x1x128xbf16> to vector<1x128xbf16>
    %183 = arith.extf %182 : vector<1x128xbf16> to vector<1x128xf32>
    %c7_80 = arith.constant 7 : index
    %c0_81 = arith.constant 0 : index
    %184 = vector.load %arg4[%c7_80, %c0_81] : memref<8x3xf32, #tpu.memory_space<vmem>>, vector<1x1xf32>
    %185 = vector.broadcast %184 : vector<1x1xf32> to vector<1x128xf32>
    %186 = arith.mulf %183, %185 : vector<1x128xf32>
    %187 = arith.addf %166, %186 : vector<1x128xf32>
    %cst_82 = arith.constant 6.000000e-02 : f32
    %188 = vector.broadcast %cst_82 : f32 to vector<1x128xf32>
    %189 = arith.mulf %188, %13 : vector<1x128xf32>
    %cst_83 = arith.constant 1.000000e+00 : f32
    %190 = vector.broadcast %cst_83 : f32 to vector<1x128xf32>
    %191 = arith.subf %190, %13 : vector<1x128xf32>
    %cst_84 = arith.constant 3.330000e-01 : f32
    %192 = vector.broadcast %cst_84 : f32 to vector<1x128xf32>
    %193 = arith.mulf %192, %191 : vector<1x128xf32>
    %194 = arith.addf %189, %193 : vector<1x128xf32>
    %195 = arith.mulf %13, %13 : vector<1x128xf32>
    %196 = arith.mulf %195, %180 : vector<1x128xf32>
    %197 = arith.mulf %194, %187 : vector<1x128xf32>
    %198 = arith.addf %196, %197 : vector<1x128xf32>
    %c0_85 = arith.constant 0 : index
    %c0_86 = arith.constant 0 : index
    %c0_87 = arith.constant 0 : index
    %199 = vector.load %arg8[%c0_85, %c0_86, %c0_87] : memref<1x1x128xf32, #tpu.memory_space<vmem>>, vector<1x1x128xf32>
    %200 = vector.shape_cast %199 : vector<1x1x128xf32> to vector<1x128xf32>
    %201 = vector.shape_cast %198 : vector<1x128xf32> to vector<1x1x128xf32>
    tpu.vector_store %arg8[%c0_85, %c0_86, %c0_87], %201 {strides = array<i32>} : memref<1x1x128xf32, #tpu.memory_space<vmem>>, vector<1x1x128xf32>,
    return
  }
  func.func @transform_0(%arg0: i32, %arg1: i32) -> (i32, i32, i32, i32) {
    %c0_i32 = arith.constant 0 : i32
    %c0_i32_0 = arith.constant 0 : i32
    %c0_i32_1 = arith.constant 0 : i32
    return %arg0, %arg1, %c0_i32, %c0_i32_0 : i32, i32, i32, i32
  }
  func.func @transform_1(%arg0: i32, %arg1: i32) -> (i32, i32, i32) {
    %c0_i32 = arith.constant 0 : i32
    %c0_i32_0 = arith.constant 0 : i32
    return %arg0, %c0_i32, %arg1 : i32, i32, i32
  }
  func.func @transform_2(%arg0: i32, %arg1: i32) -> (i32, i32) {
    %c0_i32 = arith.constant 0 : i32
    %c0_i32_0 = arith.constant 0 : i32
    %c0_i32_1 = arith.constant 0 : i32
    return %c0_i32, %c0_i32_0 : i32, i32
  }
  func.func @transform_3(%arg0: i32, %arg1: i32) -> (i32, i32) {
    %c0_i32 = arith.constant 0 : i32
    %c0_i32_0 = arith.constant 0 : i32
    %c0_i32_1 = arith.constant 0 : i32
    return %c0_i32, %c0_i32_0 : i32, i32
  }
  func.func @transform_4(%arg0: i32, %arg1: i32) -> (i32, i32) {
    %c0_i32 = arith.constant 0 : i32
    %c0_i32_0 = arith.constant 0 : i32
    %c0_i32_1 = arith.constant 0 : i32
    return %c0_i32, %c0_i32_0 : i32, i32
  }
  func.func @transform_5(%arg0: i32, %arg1: i32) -> (i32, i32) {
    %c0_i32 = arith.constant 0 : i32
    %c0_i32_0 = arith.constant 0 : i32
    %c0_i32_1 = arith.constant 0 : i32
    return %c0_i32, %c0_i32_0 : i32, i32
  }
  func.func @transform_6(%arg0: i32, %arg1: i32) -> (i32, i32, i32) {
    %c0_i32 = arith.constant 0 : i32
    %c0_i32_0 = arith.constant 0 : i32
    return %arg0, %c0_i32, %arg1 : i32, i32, i32
  }
}

</mosaic_0001>

<bundles_post_ra>
// kernel: tpu_custom_call.1
= control target key start
LH: loop header
LB: loop body
LE: loop exit
PB: predicated region body
PF: predicated region fallthrough
CT: control target
= control target key end

     0   :  { %s2342_s0 = inlined_call_operand.vmem [shape: f32[2,1,2,10], index: 0, kind: input, shape index: {}]   ;;  %s2343_s1 = inlined_call_operand.hbm [shape: bf16[2,8,128], index: 1, kind: input, shape index: {}]   ;;  %s2344_s2 = inlined_call_operand.vmem [shape: f32[8,3], index: 2, kind: input, shape index: {}]   ;;  %s2345_s3 = inlined_call_operand.vmem [shape: f32[10,128], index: 3, kind: input, shape index: {}]   ;;  %s2346_s4 = inlined_call_operand.hbm [shape: f32[10,128], index: 4, kind: input, shape index: {}]   ;;  %s2347_s5 = inlined_call_operand.vmem [shape: f32[1,10], index: 5, kind: input, shape index: {}]   ;;  %s2348_s6 = inlined_call_operand.hbm [shape: f32[2,1,128], index: 6, kind: output, shape index: {}]  }
   0x1   :  { %2353 = sst [smem:[#allocation12_spill]] %s2346_s4 }
   0x2   :  { %11 = vsyncpa [#allocation4], 0 }
   0x3   :  { %13 = vsyncpa [#allocation4 + $0x1], 0 }
   0x4   :  { %14 = vsyncpa [#allocation7], 0 }
   0x5   :  { %15 = vsyncpa [#allocation5], 0 }
   0x6   :  { %17 = vsyncpa [#allocation5 + $0x1], 0  ;;  %s1906_s21 = smov 0   ;;  %s1908_s22 = smov 0  }
   0x7   :  { %s1910_s23 = smov 0   ;;  %s1912_s24 = smov 0  }
   0x8   :  { %s1914_s25 = smov 0   ;;  %s1916_s26 = smov 0  }
   0x9 LB: > { %s1471_s27 = sadd.s32 4294967295, %s1851_s26   ;;  %s1472_s28 = sadd.s32 4294967294, %s1851_s26   ;;  %s1851_s26 = sphi %s1916_s26, %s23_s26   ;;  %s1847_s25 = sphi %s1914_s25, %s2374_s25   ;;  %s1843_s24 = sphi %s1912_s24, %s2373_s24   ;;  %s1839_s23 = sphi %s1910_s23, %s2372_s23   ;;  %s1835_s22 = sphi %s1908_s22, %s2371_s22   ;;  %s1831_s21 = sphi %s1906_s21, %s2370_s21  }
   0xa   : > { %p85_p0 = scmp.ne.s32.totalorder %s1835_s22, %s1831_s21  ;;  %p1940_p1 = scmp.eq.s32.totalorder %s1471_s27, 0 }
   0xb   : > { %p1944_p2 = scmp.eq.s32.totalorder %s1471_s27, 1  ;;  %p201_p3 = scmp.eq.s32.totalorder %s1472_s28, 1 }
   0xc   : > { %s2354_s29 = scalar_select %p1940_p1, 1, 0 }
   0xd   : > { %s2355_s30 = scalar_select %p1944_p2, 1, 0 }
   0xe   : > { %p1950_p4 = por %p1940_p1, %p85_p0  ;;  %p1473_p5 = scmp.ge.s32.totalorder %s1851_s26, 1 }
   0xf   : > { %p1955_p6 = por %p201_p3, %p85_p0  ;;  %p208_p7 = scmp.lt.s32.totalorder %s1851_s26, 3 }
  0x10   : > { %s2356_s7 = scalar_select %p1950_p4, 1, 0 }
  0x11   : > { %s2357_s8 = scalar_select %p1955_p6, 1, 0 }
  0x12   : > { %p1960_p8 = pnand %p1473_p5, %p208_p7  ;;  %s1853_s10 = smov [#allocation6]  }
  0x13   : > { %s226_s11 = sshll.u32 %s1853_s10, 4  ;;  %s35_s13 = sadd.s32 1, %s1847_s25  ;;  %s227_s11 = int_to_ptr.vmem [resolvable:$true] %s226_s11 }
  0x14   : > { %s2358_s9 = scalar_select %p1960_p8, 1, 0 }
  0x15   : > { %p1599_p9 = pneg %p1960_p8  ;;  %s2360_s4 = sld [smem:[#allocation12_spill]] }
  0x17   : > { %p1969_p11 = pnand %p1599_p9, %p1940_p1 }
  0x19   : > { %p1709_p13 = pneg %p1969_p11 }
  0x1b   : > { %s1707_s16 = scalar_lea.hbm %s2360_s4, 256 }
  0x1c   : > { %p1708_p12 = scmp.ne.s32.totalorder %s2360_s4, %s1707_s16  ;;  %p1714_p5 = scmp.lt.u32.totalorder %s1707_s16, %s2360_s4 }
  0x1e   : > { %p1710_p0 = pnand %p1709_p13, %p1708_p12 }
  0x20   : > { %p1711_p3 = pneg %p1710_p0 }
  0x22   : > { %p1716_p7 = pnand %p1714_p5, %p1711_p3 }
  0x24   : > { %1719 = shalt.err (!%p1716_p7)
}
  0x25   : > { %s1720_s27 = scalar_lea.vmem %s227_s11, 256  ;;  %p1728_p1 = scmp.lt.s32.totalorder %s227_s11, %s227_s11 }
  0x26   : > { %p1721_p9 = scmp.ne.s32.totalorder %s227_s11, %s1720_s27  ;;  %p1729_p4 = scmp.lt.s32.totalorder %s1720_s27, %s1720_s27 }
  0x28   : > { %p1723_p10 = pnand %p1721_p9, %p1709_p13  ;;  %p1730_p8 = por %p1729_p4, %p1728_p1 }
  0x2a   : > { %p1724_p6 = pneg %p1723_p10 }
  0x2c   : > { %p1731_p2 = pnand %p1730_p8, %p1724_p6 }
  0x2e   : > { %1734 = shalt.err (!%p1731_p2)
}
  0x2f   : > { %s1854_s28 = smov 128   ;;  %s1855_s10 = smov 8  }
  0x30   : > { %1602 = dma.hbm_to_vmem [thread:$0]  (!%p1969_p11), %s2360_s4, 256, %s227_s11, [#allocation7], %s1854_s28, %s1854_s28, %s1855_s10  }
  0x31   : > { %p37_p1 = scmp.ge.s32.totalorder %s35_s13, 2  ;;  %s72_s16 = sadd.s32 1, %s1839_s23 }
  0x32   : > { %p79_p2 = scmp.ne.s32.totalorder %s1839_s23, %s1835_s22  ;;  %p80_p4 = scmp.eq.s32.totalorder %s1851_s26, 0 }
  0x33   : > { %s2376_s13 = smov (%p37_p1, %s35_s13), 0  ;;  %p2362_p8 = scmp.ne.s32.totalorder %s2355_s30, 0 }
  0x34   : > { %p1996_p6 = por %p80_p4, %p79_p2  ;;  %s67_s12 = ssub.s32 %s1847_s25, %s2376_s13 }
  0x35   : > { %p2002_p10 = por %p2362_p8, %p79_p2  ;;  %p1612_p12 = scmp.lt.s32.totalorder %s1851_s26, 2 }
  0x36   : > { %p70_p11 = scmp.eq.s32.totalorder %s67_s12, 0  ;;  %s253_s11 = sand.u32 1, %s1839_s23  }
  0x37   : > { %s1476_s19 = sshll.u32 %s253_s11, 2  ;;  %s1477_s27 = sshll.u32 %s1847_s25, 6 }
  0x38   : > { %s2011_s20 = scalar_select %p70_p11, %s1839_s23, %s72_s16  }
  0x39   : > { %s2017_s14 = scalar_lea.hbm %s2343_s1, %s1477_s27  ;;  %s257_s30 = scalar_lea.vmem [#allocation3], %s1476_s19 }
  0x3a   : > { %s265_s15 = sshll.u32 %s257_s30, 4  ;;  %p2023_p13 = pnand %p1612_p12, %p1996_p6  ;;  %s2019_s15 = int_to_ptr.vmem [resolvable:$true] %s265_s15 }
  0x3b   : > { %s254_s16 = scalar_lea.sflag [#allocation4], %s253_s11  ;;  %s1735_s4 = scalar_lea.hbm %s2017_s14, 64 }
  0x3c   : > { %p1736_p0 = scmp.ne.s32.totalorder %s2017_s14, %s1735_s4  ;;  %p1737_p3 = pneg %p2023_p13 }
  0x3d   : > { %s1740_s28 = scalar_lea.hbm %s2343_s1, 128  ;;  %p1741_p9 = scmp.lt.u32.totalorder %s2017_s14, %s2343_s1 }
  0x3e   : > { %p1738_p5 = pnand %p1737_p3, %p1736_p0  ;;  %p1742_p1 = scmp.lt.u32.totalorder %s1740_s28, %s1735_s4 }
  0x3f   : > { %p1744_p4 = scmp.lt.u32.totalorder %s1735_s4, %s2017_s14 }
  0x40   : > { %p1739_p7 = pneg %p1738_p5  ;;  %p1743_p2 = por %p1742_p1, %p1741_p9 }
  0x42   : > { %p1745_p6 = por %p1744_p4, %p1743_p2 }
  0x44   : > { %p1746_p8 = pnand %p1745_p6, %p1739_p7 }
  0x46   : > { %1749 = shalt.err (!%p1746_p8)
}
  0x47   : > { %s1750_s11 = scalar_lea.vmem %s2019_s15, 64  ;;  %s1856_s30 = smov [#allocation3]  }
  0x48   : > { %p1751_p12 = scmp.ne.s32.totalorder %s2019_s15, %s1750_s11  ;;  %s1755_s19 = sshll.u32 %s1856_s30, 4  ;;  %s1756_s19 = int_to_ptr.vmem [resolvable:$false] %s1755_s19 }
  0x49   : > { %s1757_s27 = scalar_lea.vmem %s1756_s19, 128  ;;  %p1758_p5 = scmp.lt.s32.totalorder %s2019_s15, %s1756_s19 }
  0x4a   : > { %p1753_p11 = pnand %p1751_p12, %p1737_p3  ;;  %p1759_p9 = scmp.lt.s32.totalorder %s1757_s27, %s1750_s11 }
  0x4c   : > { %p1754_p0 = pneg %p1753_p11  ;;  %p1760_p1 = por %p1759_p9, %p1758_p5 }
  0x4e   : > { %p1761_p2 = pnand %p1760_p1, %p1754_p0 }
  0x50   : > { %1764 = shalt.err (!%p1761_p2)
}
  0x51   : > { %1606 = dma.hbm_to_vmem [thread:$0]  (!%p2023_p13), %s2017_s14, 64, %s2019_s15, %s254_s16  }
  0x52   : > { %p2365_p7 = scmp.ne.s32.totalorder %s2358_s9, 0 }
  0x53   : > { %s2055_s4 = sand.u32 (!%p2365_p7), 1, %s1835_s22   ;;  %p2366_p3 = scmp.ne.s32.totalorder (!%p2365_p7), %s2356_s7, 0 }
  0x54   : > { %274 = sbr.rel (%p2365_p7) target bundleno = 481 (0x1e1), region = 44  ;;  %s1479_s28 = sshll.u32 (!%p2365_p7), %s2055_s4, 2 }
  0x55   : > { %s277_s17 = scalar_lea.sflag (!%p2365_p7), [#allocation4], %s2055_s4  ;;  %s2059_s10 = scalar_lea.vmem (!%p2365_p7), [#allocation3], %s1479_s28 }
  0x5b   : > { %1818 = dma.done.wait (%p2366_p3), %s277_s17, 64  }
  0x5c   : > { %1820 = vsyncadd (%p2366_p3), %s277_s17, 4294967232  ;;  %p2367_p13 = scmp.ne.s32.totalorder %s2354_s29, 0 }
  0x5e   : > { %1822 = dma.done.wait (%p2367_p13), [#allocation7], 256  }
  0x5f   : > { %1824 = vsyncadd (%p2367_p13), [#allocation7], 4294967040  ;;  %vm330_vm0 = vcmask 0   ;;  %v1857_v0 = vmov 0.0|0.0   ;;  %v1858_v1 = vmov 0.0   ;;  %p319_p4 = scmp.lt.s32.totalorder %s1843_s24, 1  ;;  %v808_v51 = vlaneseq }
  0x60   : > { %1565 = vmatprep.subr.bf16.mxu0 %v1857_v0  ;;  %1568 = vmatprep.subr.bf16.mxu1 %v1857_v0  ;;  %331 = vst.msk [vmem:[#allocation2] sm:$0x1] %vm330_vm0, %v1858_v1  ;;  %vm1859_vm1 = vmmov 0   ;;  %v1860_v2 = vmov 1   ;;  %v1861_v3 = vmov 0   ;;  %vm340_vm2 = vcmask 1041408  }
  0x61   : > { %1520 = vmatprep.mubr.msk.f32.mxu0 %vm1859_vm1, %v1858_v1  ;;  %1527 = vmatprep.mubr.msk.f32.mxu1 %vm1859_vm1, %v1858_v1  ;;  %s320_s29 = scalar_select %p319_p4, %s1843_s24, 1  ;;  %vm336_vm3 = vcmask 80896   ;;  %v334_v4 = vld [vmem:[%s2345_s3] sm:$0xff]  ;;  %v335_v5 = vld [vmem:[%s2345_s3 + $0x8] sm:$0x3]  ;;  %v1862_v21 = vmov 2  }
  0x62   : > { %1680 = vset.pattern.permute.xlu1 %v1860_v2  ;;  %1679 = vset.pattern.permute.xlu0 %v1861_v3  ;;  %v342_v7 = vsel %vm340_vm2, %v335_v5, 0  ;;  %v345_v8 = vand.u32 4294901760, %v334_v4  ;;  %v2098_v10 = vld [vmem:[%s2344_s2] sm:$0x1]  ;;  %v1137_v27 = vld [vmem:[%s2344_s2 + $0x1] sm:$0x1] }
  0x63   : > { %s1481_s7 = sshll.u32 %s320_s29, 1  ;;  %v348_v11 = vand.u32 4294901760, %v342_v7  ;;  %1115 = vperm.xlu1 %1680, %v2098_v10   ;;  %v813_v32 = vld [vmem:[#allocation6] sm:$0xff]  ;;  %v814_v33 = vld [vmem:[#allocation6 + $0x8] sm:$0x3]  ;;  %vm1863_vm4 = vmmov 1  }
  0x64   : > { %s325_s15 = scalar_lea.vmem %s2342_s0, %s1481_s7  ;;  %v423_v13 = vsub.f32 %v334_v4, %v345_v8  ;;  %v1584_v34 = vpack.c.bf16 %v814_v33, %v813_v32  ;;  %vm1585_vm5 = vmpackc.low %vm340_vm2, %vm1863_vm4  ;;  %v1167_v36 = vld [vmem:[%s2344_s2 + $0x2] sm:$0x1]  ;;  %v891_v37 = vld [vmem:[%s2347_s5] sm:$0x1]  ;;  %vm893_vm6 = vcmask 73728   ;;  %v809_v54 = vshrl.u32 %v808_v51, 7 }
  0x65   : > { %v2090_v6 = vld [vmem:[%s325_s15] sm:$0x3]  ;;  %v1566_v15 = vpack.c.bf16 %v348_v11, %v345_v8  ;;  %v430_v16 = vsub.f32 %v342_v7, %v348_v11  ;;  %v1199_v40 = vld [vmem:[%s2344_s2 + $0x3] sm:$0x1]  ;;  %v1229_v41 = vld [vmem:[%s2344_s2 + $0x4] sm:$0x1] }
  0x66   : > { %v338_v9 = vsel %vm336_vm3, %v2090_v6, 0  ;;  %v424_v18 = vand.u32 4294901760, %v423_v13  ;;  %v815_v35 = vrot.slane %v2090_v6, 1  ;;  %v892_v38 = vmul.f32 %v891_v37, %v2090_v6  ;;  %v1261_v42 = vld [vmem:[%s2344_s2 + $0x5] sm:$0x1]  ;;  %s318_s7 = scalar_lea.vmem [#allocation8], %s2055_s4 }
  0x67   : > { %v411_v12 = vand.u32 4294901760, %v338_v9  ;;  %v2101_v14 = vld [vmem:[#allocation2] sm:$0x1]  ;;  %1567 = vmatpush3.bf16.msra.mxu0 %v1566_v15  ;;  %v431_v19 = vand.u32 4294901760, %v430_v16  ;;  %1681 = vset.pattern.permute.xlu1 %v1862_v21  ;;  %v1572_v26 = vpack.c.bf16 %v430_v16, %v423_v13  ;;  %v1291_v43 = vld [vmem:[%s2344_s2 + $0x6] sm:$0x1] }
  0x68   : > { %805 = vperm.xlu0 %1679, %v2101_v14   ;;  %v425_v22 = vsub.f32 %v423_v13, %v424_v18  ;;  %1571 = vmatprep.subr.bf16.mxu0 %v1857_v0  ;;  %v894_v39 = vsel %vm893_vm6, %v892_v38, 0.0  ;;  %v1323_v44 = vld [vmem:[%s2344_s2 + $0x7] sm:$0x1]  ;;  %v810_v61 = vsub.s32 0, %v809_v54  ;;  %v1866_v32 = vmov 2131351028  }
  0x69   : > { %v412_v17 = vsub.f32 %v338_v9, %v411_v12  ;;  %1120 = vperm.xlu1 %1681, %v2098_v10   ;;  %v432_v23 = vsub.f32 %v430_v16, %v431_v19  ;;  %v1578_v31 = vpack.c.bf16 %v431_v19, %v424_v18  ;;  %v1868_v38 = vmov 920167782   ;;  %s1370_s9 = sshll.u32 %s318_s7, 4  ;;  %s1357_s16 = scalar_lea.sflag [#allocation5], %s2055_s4  ;;  %s2295_s9 = int_to_ptr.vmem [resolvable:$true] %s1370_s9 }
  0x6a   : > { %v426_v25 = vand.u32 4294901760, %v425_v22  ;;  %s1765_s11 = scalar_lea.vmem %s2295_s9, 16 }
  0x6b   : > { %v413_v20 = vand.u32 4294901760, %v412_v17  ;;  %v433_v28 = vand.u32 4294901760, %v432_v23  ;;  %p1766_p6 = scmp.ne.s32.totalorder %s2295_s9, %s1765_s11 }
  0x6c   : > { %1694 = vset.pattern.permute.xlu0 %v1862_v21 }
  0x6d   : > { %v414_v24 = vsub.f32 %v412_v17, %v413_v20  ;;  %1682 = vset.pattern.permute.xlu1 %v1860_v2  ;;  %v1569_v30 = vpack.c.bf16 %v433_v28, %v426_v25  ;;  %p1767_p8 = pnand %p1766_p6, %p2002_p10 }
  0x6e   : > { %1140 = vperm.xlu1 %1682, %v1137_v27  }
  0x6f   : > { %v415_v29 = vand.u32 4294901760, %v414_v24  ;;  %1570 = vmatpush3.bf16.msra.mxu1 %v1569_v30  ;;  %p1768_p12 = pneg %p1767_p8 }
  0x70   : > { %1574 = vmatprep.subr.bf16.mxu1 %v1857_v0 }
  0x71   : > { %1521 = vmatmul.mubr.f32.vlgmr.msra.gmra.mrb[0].mxu0 %v415_v29  ;;  %v1865_v29 = vmov 2475754826  }
  0x72   : > { %1573 = vmatpush3.bf16.msra.mxu0 %v1572_v26  ;;  %1534 = vmatprep.mubr.msk.f32.mxu0 %vm1859_vm1, %v1858_v1 }
  0x73   : > { %1577 = vmatprep.subr.bf16.mxu0 %v1857_v0  ;;  %1683 = vset.pattern.permute.xlu1 %v1862_v21 }
  0x74   : > { %1528 = vmatmul.mubr.f32.vlgmr.msra.gmra.mrb[0].mxu1 %v411_v12  ;;  %1146 = vperm.xlu1 %1683, %v1137_v27  }
  0x75   : > { %1535 = vmatmul.mubr.f32.vlgmr.msra.gmra.mrb[2].mxu0 %v412_v17  ;;  %1576 = vmatpush3.bf16.msra.mxu1 %v1566_v15 }
  0x76   : > { %1579 = vmatpush3.bf16.msra.mxu0 %v1578_v31  ;;  %1541 = vmatprep.mubr.msk.f32.mxu1 %vm1859_vm1, %v1858_v1 }
  0x77   : > { %1580 = vmatprep.subr.bf16.mxu1 %v1857_v0  ;;  %1548 = vmatprep.mubr.msk.f32.mxu0 %vm1859_vm1, %v1858_v1 }
  0x78   : > { %1583 = vmatprep.subr.bf16.mxu0 %v1857_v0  ;;  %1542 = vmatmul.mubr.f32.vlgmr.msra.gmra.mrb[2].mxu1 %v413_v20 }
  0x79   : > { %1549 = vmatmul.mubr.f32.vlgmr.msra.gmra.mrb[4].mxu0 %v411_v12  ;;  %1582 = vmatpush3.bf16.msra.mxu1 %v1566_v15 }
  0x7a   : > { %1586 = vmatpush3.bf16.msk.msra.mxu0 %vm1585_vm5, %v1584_v34  ;;  %1555 = vmatprep.mubr.msk.f32.mxu1 %vm1859_vm1, %v1858_v1 }
  0x7b   : > { %1562 = vmatprep.mubr.msk.f32.mxu0 %vm1859_vm1, %v1858_v1  ;;  %1684 = vset.pattern.permute.xlu1 %v1860_v2 }
  0x7c   : > { %1556 = vmatmul.mubr.f32.vlgmr.msra.gmra.mrb[4].mxu1 %v411_v12  ;;  %1170 = vperm.xlu1 %1684, %v1167_v36  }
  0x7d   : > { %1563 = vmatmul.mubr.msk.f32.vlgmr.msra.gmra.mrb[6].mxu0 %vm336_vm3, %v815_v35  ;;  %v1867_v35 = vmov 2102212464  }
  0x80   : > { %1685 = vset.pattern.permute.xlu1 %v1862_v21 }
  0x81   : > { %1176 = vperm.xlu1 %1685, %v1167_v36  }
  0x85   : > { %1686 = vset.pattern.permute.xlu1 %v1860_v2 }
  0x86   : > { %1202 = vperm.xlu1 %1686, %v1199_v40  }
  0x87   : > { %895 = vadd.xlane.f32.xlu0 %v894_v39 }
  0x8a   : > { %1687 = vset.pattern.permute.xlu1 %v1861_v3 }
  0x8b   : > { %1152 = vperm.xlu1 %1687, %v1137_v27   ;;  %v1864_v27 = vmov 683565275  }
  0x8f   : > { %1688 = vset.pattern.permute.xlu1 %v1862_v21 }
  0x90   : > { %1208 = vperm.xlu1 %1688, %v1199_v40  }
  0x94   : > { %1689 = vset.pattern.permute.xlu1 %v1860_v2 }
  0x95   : > { %1232 = vperm.xlu1 %1689, %v1229_v41  }
  0x99   : > { %1690 = vset.pattern.permute.xlu1 %v1861_v3 }
  0x9a   : > { %1128 = vperm.xlu1 %1690, %v2098_v10  }
  0x9d   : > { %1270 = vperm.xlu0 %1694, %v1261_v42  }
  0x9e   : > { %1214 = vperm.xlu1 %1690, %v1199_v40  }
  0xa1   : > { %1695 = vset.pattern.permute.xlu0 %v1861_v3 }
  0xa2   : > { %1184 = vperm.xlu0 %1695, %v1167_v36   ;;  %1691 = vset.pattern.permute.xlu1 %v1862_v21 }
  0xa3   : > { %1238 = vperm.xlu1 %1691, %v1229_v41  }
  0xa6   : > { %1308 = vperm.xlu0 %1695, %v1291_v43  }
  0xa7   : > { %1692 = vset.pattern.permute.xlu1 %v1861_v3 }
  0xa8   : > { %1246 = vperm.xlu1 %1692, %v1229_v41   ;;  %v1869_v41 = vmov 1326507024  }
  0xaa   : > { %1700 = vset.pattern.permute.xlu0 %v1860_v2 }
  0xab   : > { %1326 = vperm.xlu0 %1700, %v1323_v44  }
  0xac   : > { %1693 = vset.pattern.permute.xlu1 %v1860_v2 }
  0xad   : > { %1264 = vperm.xlu1 %1693, %v1261_v42  }
  0xaf   : > { %1702 = vset.pattern.permute.xlu0 %v1861_v3 }
  0xb1   : > { %1696 = vset.pattern.permute.xlu1 %v1861_v3 }
  0xb2   : > { %1276 = vperm.xlu1 %1696, %v1261_v42  }
  0xb6   : > { %1697 = vset.pattern.permute.xlu1 %v1860_v2 }
  0xb7   : > { %1294 = vperm.xlu1 %1697, %v1291_v43  }
  0xbb   : > { %1698 = vset.pattern.permute.xlu1 %v1862_v21 }
  0xbc   : > { %1300 = vperm.xlu1 %1698, %v1291_v43  }
  0xc0   : > { %1699 = vset.pattern.permute.xlu1 %v1861_v3 }
  0xc1   : > { %1338 = vperm.xlu1 %1699, %v1323_v44  }
  0xc5   : > { %1701 = vset.pattern.permute.xlu1 %v1862_v21 }
  0xc6   : > { %1332 = vperm.xlu1 %1701, %v1323_v44  }
  0xe2   : > { %v2175_v10 = vpop.permute.xlu1 %1115 }
  0xe7   : > { %v806_v45 = vpop.permute.xlu0 %805 }
  0xe8   : > { %v811_v3 = vrot.slane %v806_v45, %v810_v61 }
 0x114   : > { %v896_v46 = vpop.xlane.xlu0 %895 }
 0x115   : > { %v897_v47 = vadd.f32 %v896_v46, %v2101_v14  ;;  %v2179_v14 = vpop.permute.xlu1 %1120 }
 0x117   : > { %v898_v48 = vfloor.f32 %v897_v47 }
 0x119   : > { %v899_v49 = vsub.f32 %v897_v47, %v898_v48  ;;  %v2182_v18 = vpop.permute.xlu1 %1140 }
 0x11b   : > { %901 = vst.msk [vmem:[#allocation2] sm:$0x1] %vm330_vm0, %v899_v49 }
 0x11d   : > { %v2185_v23 = vpop.permute.xlu1 %1146 }
 0x121   : > { %v2189_v47 = vpop.permute.xlu1 %1170 }
 0x144   : > { %v417_v50 = vpop.f32.mrb[0].mxu0 }
 0x145   : > { %v1522_v52 = vpop.f32.mrb[1].mxu0 }
 0x147   : > { %v498_v55 = vpop.f32.mrb[0].mxu1 }
 0x148   : > { %v574_v53 = vpop.f32.mrb[2].mxu0  ;;  %v499_v57 = vadd.f32 %v498_v55, %v417_v50  ;;  %v1529_v58 = vpop.f32.mrb[1].mxu1 }
 0x149   : > { %v1536_v56 = vpop.f32.mrb[3].mxu0 }
 0x14a   : > { %v575_v59 = vadd.f32 %v574_v53, %v499_v57 }
 0x14b   : > { %v649_v62 = vpop.f32.mrb[2].mxu1 }
 0x14c   : > { %v726_v60 = vpop.f32.mrb[4].mxu0  ;;  %v650_v0 = vadd.f32 %v649_v62, %v575_v59  ;;  %v1543_v1 = vpop.f32.mrb[3].mxu1 }
 0x14d   : > { %v1550_v63 = vpop.f32.mrb[5].mxu0 }
 0x14e   : > { %v727_v2 = vadd.f32 %v726_v60, %v650_v0 }
 0x14f   : > { %v799_v5 = vpop.f32.mrb[4].mxu1 }
 0x150   : > { %v2173_v4 = vpop.f32.mrb[6].mxu0  ;;  %v800_v7 = vadd.f32 %v799_v5, %v727_v2  ;;  %v1557_v8 = vpop.f32.mrb[5].mxu1 }
 0x151   : > { %v1564_v6 = vpop.f32.mrb[7].mxu0 }
 0x152   : > { %v812_v9 = vadd.f32 %v811_v3, %v800_v7  ;;  %v2197_v3 = vpop.permute.xlu1 %1176 }
 0x154   : > { %v902_v11 = vfloor.f32 %v812_v9 }
 0x156   : > { %v903_v12 = vsub.f32 %v812_v9, %v902_v11  ;;  %v2202_v9 = vpop.permute.xlu1 %1202 }
 0x158   : > { %v2177_v13 = vmul.f32 6.2831855, %v903_v12 }
 0x15a   : > { %v908_v15 = vand.u32 2139095040, %v2177_v13  ;;  %v905_v20 = vand.u32 2147483647, %v2177_v13  ;;  %vm907_vm14 = vcmp.lt.s32.totalorder %v2177_v13, 0  ;;  %vm997_vm6 = vweird.f32 %v2177_v13 }
 0x15c   : > { %v909_v16 = vshrl.u32 %v908_v15, 23  ;;  %v912_v24 = vand.u32 8388607, %v905_v20  ;;  %vm906_vm15 = vcmp.le.f32.partialorder %v905_v20, 0.7853982 }
 0x15e   : > { %v1484_v17 = vadd.s32 4294967169, %v909_v16  ;;  %v913_v43 = vor.u32 8388608, %v912_v24  ;;  %v2204_v16 = vpop.permute.xlu1 %1152 }
 0x160   : > { %v915_v19 = vadd.s32 1, %v1484_v17  ;;  %v953_v58 = vshll.u32 %v913_v43, 8 }
 0x162   : > { %vm916_vm7 = vcmp.gt.s32.totalorder %v915_v19, 0 }
 0x163   : > { %v917_v21 = vsel %vm916_vm7, %v915_v19, 0 }
 0x164   : > { %v919_v22 = vand.u32 31, %v917_v21  ;;  %v918_v26 = vshrl.u32 %v917_v21, 5 }
 0x166   : > { %v920_v25 = vsub.s32 32, %v919_v22  ;;  %v922_v28 = vshll.u32 %v1864_v27, %v919_v22  ;;  %v925_v30 = vshll.u32 %v1865_v29, %v919_v22  ;;  %v928_v34 = vshll.u32 %v1866_v32, %v919_v22 }
 0x167   : > { %v931_v37 = vshll.u32 %v1867_v35, %v919_v22  ;;  %v934_v40 = vshll.u32 %v1868_v38, %v919_v22  ;;  %vm937_vm8 = vcmp.lt.s32.totalorder %v918_v26, 1  ;;  %vm940_vm9 = vcmp.lt.s32.totalorder %v918_v26, 4  ;;  %v2206_v22 = vpop.permute.xlu1 %1208 }
 0x168   : > { %v923_v31 = vshrl.u32 %v1865_v29, %v920_v25  ;;  %v926_v33 = vshrl.u32 %v1866_v32, %v920_v25  ;;  %v929_v36 = vshrl.u32 %v1867_v35, %v920_v25  ;;  %v932_v39 = vshrl.u32 %v1868_v38, %v920_v25 }
 0x169   : > { %v935_v42 = vshrl.u32 %v1869_v41, %v920_v25  ;;  %v921_v53 = vshrl.u32 %v1864_v27, %v920_v25  ;;  %vm939_vm10 = vcmp.lt.s32.totalorder %v918_v26, 3  ;;  %vm938_vm11 = vcmp.lt.s32.totalorder %v918_v26, 2 }
 0x16a   : > { %v924_v44 = vor.u32 %v923_v31, %v922_v28  ;;  %v927_v45 = vor.u32 %v926_v33, %v925_v30  ;;  %v930_v46 = vor.u32 %v929_v36, %v928_v34  ;;  %v933_v48 = vor.u32 %v932_v39, %v931_v37 }
 0x16b   : > { %v936_v49 = vor.u32 %v935_v42, %v934_v40  ;;  %v2208_v27 = vpop.permute.xlu1 %1232 }
 0x16c   : > { %v942_v50 = vsel %vm940_vm9, %v930_v46, 2102212464  ;;  %v945_v51 = vsel %vm937_vm8, %v924_v44, %v927_v45  ;;  %v949_v52 = vsel %vm937_vm8, %v927_v45, %v930_v46  ;;  %v946_v54 = vsel %vm940_vm9, %v933_v48, 920167782 }
 0x16d   : > { %v950_v55 = vsel %vm940_vm9, %v936_v49, 1326507024  ;;  %v947_v56 = vsel %vm939_vm10, %v930_v46, %v946_v54  ;;  %v941_v59 = vsel %vm937_vm8, %v921_v53, %v924_v44  ;;  %v943_v60 = vsel %vm939_vm10, %v927_v45, %v942_v50  ;;  %v2221_v53 = vpop.permute.xlu0 %1270 }
 0x16e   : > { %v951_v57 = vsel %vm939_vm10, %v933_v48, %v950_v55  ;;  %v948_v61 = vsel %vm938_vm11, %v945_v51, %v947_v56  ;;  %v944_v5 = vsel %vm938_vm11, %v941_v59, %v943_v60  ;;  %v1125_v56 = vld [vmem:[%s2059_s10] sm:$0x1]  ;;  %v1154_v60 = vrot.slane %v2204_v16, 7 }
 0x16f   : > { %v952_v62 = vsel %vm938_vm11, %v949_v52, %v951_v57  ;;  %v2194_v1 = vmul.u32.u64.low %v953_v58, %v948_v61  ;;  %v2195_v2 = vmul.u32.u64.high %v953_v58, %v948_v61, %v2194_v1  ;;  %v960_v7 = vmul.u32 %v953_v58, %v944_v5  ;;  %v1129_v35 = vpop.permute.xlu1 %1128 }
 0x170   : > { %v2191_v63 = vmul.u32.u64.low %v953_v58, %v952_v62  ;;  %v2192_v0 = vmul.u32.u64.high %v953_v58, %v952_v62, %v2191_v63  ;;  %v1126_v59 = vunpack.c.l.bf16 %v1125_v56 }
 0x171   : > { %v963_v6 = vadd.s32 1, %v2195_v2 }
 0x172   : > { %vm962_vm12 = vc.u32 %v2192_v0, %v2194_v1  ;;  %v961_v29 = vadd.s32 %v2194_v1, %v2192_v0  ;;  %v1181_v1 = vld [vmem:[%s2059_s10] sm:$0x2] }
 0x173   : > { %v964_v8 = vsel %vm962_vm12, %v963_v6, %v2195_v2  ;;  %v2211_v41 = vpop.permute.xlu1 %1214  ;;  %v1185_v2 = vpop.permute.xlu0 %1184  ;;  %v1182_v16 = vunpack.c.l.bf16 %v1181_v1 }
 0x174   : > { %v965_v11 = vadd.s32 %v964_v8, %v960_v7 }
 0x176   : > { %v966_v12 = vadd.s32 536870912, %v965_v11 }
 0x177   : > { %v2217_v49 = vpop.permute.xlu1 %1238 }
 0x178   : > { %v967_v15 = vshrl.u32 %v966_v12, 30 }
 0x17a   : > { %v968_v17 = vshll.u32 %v967_v15, 30  ;;  %v991_v43 = vsub.s32 4, %v967_v15 }
 0x17b   : > { %v2219_v52 = vpop.permute.xlu1 %1246 }
 0x17c   : > { %v969_v19 = vsub.s32 %v965_v11, %v968_v17  ;;  %v992_v46 = vsel %vm907_vm14, %v991_v43, %v967_v15  ;;  %v1156_v11 = vmul.f32 %v1154_v60, %v1126_v59  ;;  %v1186_v17 = vrot.slane %v1185_v2, 6 }
 0x17d   : > { %v994_v50 = vsel %vm906_vm15, 0, %v992_v46 }
 0x17e   : > { %v971_v21 = vsub.s32 0, %v969_v19  ;;  %v998_v51 = vadd.s32 3, %v994_v50  ;;  %v1102_v55 = vand.u32 3, %v994_v50 }
 0x17f   : > { %v2225_v61 = vpop.permute.xlu1 %1264 }
 0x180   : > { %v1485_v24 = vmin.u32 %v971_v21, %v969_v19  ;;  %v999_v54 = vand.u32 3, %v998_v51  ;;  %vm1107_vm1 = vcmp.eq.s32.totalorder %v1102_v55, 2  ;;  %vm1104_vm3 = vcmp.eq.s32.totalorder %v1102_v55, 0 }
 0x181   : > { %vm1103_vm5 = vcmp.lt.s32.totalorder %v1102_v55, 2 }
 0x182   : > { %v973_v25 = vclz %v1485_v24  ;;  %vm1004_vm0 = vcmp.eq.s32.totalorder %v999_v54, 2  ;;  %vm1001_vm2 = vcmp.eq.s32.totalorder %v999_v54, 0  ;;  %vm1000_vm4 = vcmp.lt.s32.totalorder %v999_v54, 2 }
 0x184   : > { %v1486_v26 = vadd.s32 4294967294, %v973_v25  ;;  %v1277_v25 = vpop.permute.xlu1 %1276 }
 0x186   : > { %vm1487_vm13 = vcmp.lt.s32.totalorder %v1486_v26, 0 }
 0x187   : > { %v976_v28 = vsel %vm1487_vm13, 0, %v1486_v26 }
 0x188   : > { %v977_v30 = vsub.s32 32, %v976_v28  ;;  %v981_v31 = vsub.s32 4294967266, %v976_v28  ;;  %v978_v32 = vshll.u32 %v969_v19, %v976_v28  ;;  %v2251_v43 = vpop.permute.xlu1 %1294 }
 0x18a   : > { %v979_v33 = vshrl.u32 %v961_v29, %v977_v30  ;;  %v982_v34 = vadd.s32 127, %v981_v31  ;;  %v1158_v31 = vrot.slane %v1156_v11, 1 }
 0x18c   : > { %v980_v36 = vor.u32 %v979_v33, %v978_v32  ;;  %v983_v37 = vshll.u32 %v982_v34, 23  ;;  %v1131_v32 = vmul.f32 %v1129_v35, %v1126_v59 }
 0x18e   : > { %v984_v38 = vor.u32 4788187, %v983_v37  ;;  %v987_v40 = vcvt.s32.f32 %v980_v36  ;;  %v1243_v36 = vld [vmem:[%s2059_s10] sm:$0x4]  ;;  %v1188_v37 = vmul.f32 %v1186_v17, %v1182_v16  ;;  %v1160_v46 = vadd.f32 %v1158_v31, %v1131_v32 }
 0x190   : > { %v985_v39 = vand.u32 2147483647, %v984_v38  ;;  %v1190_v50 = vrot.slane %v1188_v37, 2 }
 0x192   : > { %v988_v42 = vmul.f32 %v987_v40, %v985_v39 }
 0x194   : > { %v989_v44 = vxor.u32 2147483648, %v988_v42 }
 0x196   : > { %v990_v45 = vsel %vm907_vm14, %v989_v44, %v988_v42 }
 0x197   : > { %v993_v48 = vsel %vm906_vm15, %v2177_v13, %v990_v45  ;;  %v1244_v45 = vunpack.c.l.bf16 %v1243_v36 }
 0x198   : > { %1703 = vcosq.f32 %v993_v48 }
 0x199   : > { %1705 = vsinq.f32 %v993_v48  ;;  %v1248_v48 = vrot.slane %v2219_v52, 4  ;;  %v1278_v52 = vrot.slane %v1277_v25, 3 }
 0x1a2   : > { %v1704_v57 = vpop.eup %1703 }
 0x1a3   : > { %v1706_v20 = vpop.eup %1705  ;;  %v1005_v58 = vxor.u32 2147483648, %v1704_v57 }
 0x1a4   : > { %v1002_v62 = vxor.u32 2147483648, %v1706_v20 }
 0x1a5   : > { %v1006_v63 = vsel %vm1004_vm0, %v1005_v58, %v1706_v20  ;;  %v1109_v0 = vsel %vm1107_vm1, %v1005_v58, %v1706_v20 }
 0x1a6   : > { %v1003_v5 = vsel %vm1001_vm2, %v1704_v57, %v1002_v62  ;;  %v1106_v6 = vsel %vm1104_vm3, %v1704_v57, %v1002_v62  ;;  %v1250_v62 = vmul.f32 %v1248_v48, %v1244_v45 }
 0x1a7   : > { %v1007_v7 = vsel %vm1000_vm4, %v1003_v5, %v1006_v63  ;;  %v1110_v8 = vsel %vm1103_vm5, %v1106_v6, %v1109_v0  ;;  %v1192_v63 = vadd.f32 %v1190_v50, %v1160_v46  ;;  %v1301_v0 = vpop.permute.xlu1 %1300  ;;  %v1305_v6 = vld [vmem:[%s2059_s10] sm:$0x8]  ;;  %s1492_s10 = sshll.u32 %s1843_s24, 4  ;;  %s1870_s24 = smov [#allocation8]  }
 0x1a8   : > { %v2229_v12 = vsel %vm997_vm6, nan, %v1007_v7  ;;  %v2231_v15 = vsel %vm997_vm6, nan, %v1110_v8  ;;  %v1309_v7 = vpop.permute.xlu0 %1308  ;;  %v1252_v25 = vrot.slane %v1250_v62, 4  ;;  %s2293_s12 = scalar_lea.hbm %s2348_s6, %s1492_s10  ;;  %s1769_s30 = sshll.u32 %s1870_s24, 4  ;;  %s1770_s30 = int_to_ptr.vmem [resolvable:$false] %s1769_s30 }
 0x1a9   : > { %v1118_v19 = vmul.f32 %v2175_v10, %v2229_v12  ;;  %v1123_v21 = vmul.f32 %v2179_v14, %v2231_v15  ;;  %v1132_v24 = vmul.f32 %v2231_v15, %v2229_v12  ;;  %v1134_v13 = vmul.f32 %v2231_v15, %v2231_v15  ;;  %s1771_s19 = scalar_lea.vmem %s1770_s30, 32  ;;  %p1772_p11 = scmp.lt.s32.totalorder %s2295_s9, %s1770_s30 }
 0x1aa   : > { %v1135_v26 = vmul.f32 %v2229_v12, %v2229_v12  ;;  %v1216_v10 = vrot.slane %v2211_v41, 5  ;;  %p1773_p0 = scmp.lt.s32.totalorder %s1771_s19, %s1765_s11 }
 0x1ab   : > { %v1124_v28 = vadd.f32 %v1123_v21, %v1118_v19  ;;  %v1133_v29 = vadd.f32 %v1132_v24, %v1132_v24  ;;  %v1306_v21 = vunpack.c.l.bf16 %v1305_v6  ;;  %v1310_v24 = vrot.slane %v1309_v7, 2  ;;  %v1339_v31 = vpop.permute.xlu1 %1338 }
 0x1ac   : > { %v1136_v30 = vsub.f32 %v1134_v13, %v1135_v26  ;;  %v1218_v41 = vmul.f32 %v1216_v10, %v1182_v16  ;;  %v1327_v62 = vpop.permute.xlu0 %1326  ;;  %p1774_p5 = por %p1773_p0, %p1772_p11 }
 0x1ad   : > { %v1143_v33 = vmul.f32 %v2182_v18, %v1133_v29  ;;  %v1161_v14 = vmul.f32 %v1133_v29, %v2231_v15  ;;  %v1165_v34 = vmul.f32 %v1133_v29, %v2229_v12 }
 0x1ae   : > { %v1162_v38 = vmul.f32 %v1136_v30, %v2229_v12  ;;  %v1164_v39 = vmul.f32 %v1136_v30, %v2231_v15  ;;  %v1149_v42 = vmul.f32 %v2185_v23, %v1136_v30  ;;  %v1220_v59 = vrot.slane %v1218_v41, 3  ;;  %p1775_p9 = pnand %p1774_p5, %p1768_p12 }
 0x1af   : > { %v1144_v40 = vadd.f32 %v1143_v33, %v1124_v28 }
 0x1b0   : > { %v1163_v35 = vadd.f32 %v1162_v38, %v1161_v14  ;;  %v1166_v44 = vsub.f32 %v1164_v39, %v1165_v34  ;;  %v1222_v26 = vadd.f32 %v1220_v59, %v1192_v63  ;;  %v1312_v34 = vmul.f32 %v1310_v24, %v1306_v21 }
 0x1b1   : > { %v1150_v18 = vadd.f32 %v1149_v42, %v1144_v40  ;;  %v1340_v39 = vrot.slane %v1339_v31, 1  ;;  %v1347_v63 = vmul.f32 0.06, %v2173_v4 }
 0x1b2   : > { %v1173_v51 = vmul.f32 %v2189_v47, %v1163_v35  ;;  %v1193_v54 = vmul.f32 %v1163_v35, %v2231_v15  ;;  %v1194_v55 = vmul.f32 %v1166_v44, %v2229_v12  ;;  %v1196_v23 = vmul.f32 %v1166_v44, %v2231_v15 }
 0x1b3   : > { %v1197_v56 = vmul.f32 %v1163_v35, %v2229_v12  ;;  %v1179_v20 = vmul.f32 %v2197_v3, %v1166_v44  ;;  %v1254_v38 = vadd.f32 %v1252_v25, %v1222_v26  ;;  %v1314_v50 = vrot.slane %v1312_v34, 6 }
 0x1b4   : > { %v1174_v57 = vadd.f32 %v1173_v51, %v1150_v18  ;;  %v1195_v58 = vadd.f32 %v1194_v55, %v1193_v54  ;;  %v1342_v54 = vmul.f32 %v1340_v39, %v1306_v21  ;;  %v1348_v55 = vsub.f32 1.0, %v2173_v4 }
 0x1b5   : > { %v1198_v60 = vsub.f32 %v1196_v23, %v1197_v56 }
 0x1b6   : > { %v1180_v47 = vadd.f32 %v1179_v20, %v1174_v57  ;;  %v1205_v1 = vmul.f32 %v2202_v9, %v1195_v58  ;;  %v1223_v2 = vmul.f32 %v1195_v58, %v2231_v15  ;;  %v1227_v5 = vmul.f32 %v1195_v58, %v2229_v12 }
 0x1b7   : > { %v1224_v8 = vmul.f32 %v1198_v60, %v2229_v12  ;;  %v1226_v3 = vmul.f32 %v1198_v60, %v2231_v15  ;;  %v1211_v16 = vmul.f32 %v2206_v22, %v1198_v60  ;;  %v1280_v9 = vmul.f32 %v1278_v52, %v1244_v45 }
 0x1b8   : > { %v1206_v11 = vadd.f32 %v1205_v1, %v1180_v47  ;;  %v1344_v52 = vrot.slane %v1342_v54, 7  ;;  %v1349_v47 = vmul.f32 0.333, %v1348_v55 }
 0x1b9   : > { %v1225_v17 = vadd.f32 %v1224_v8, %v1223_v2  ;;  %v1228_v19 = vsub.f32 %v1226_v3, %v1227_v5  ;;  %v1282_v37 = vrot.slane %v1280_v9, 5  ;;  %v1333_v2 = vpop.permute.xlu1 %1332 }
 0x1ba   : > { %v1212_v13 = vadd.f32 %v1211_v16, %v1206_v11 }
 0x1bb   : > { %v1235_v28 = vmul.f32 %v2208_v27, %v1225_v17  ;;  %v1255_v29 = vmul.f32 %v1225_v17, %v2231_v15  ;;  %v1256_v30 = vmul.f32 %v1228_v19, %v2229_v12  ;;  %v1258_v32 = vmul.f32 %v1228_v19, %v2231_v15 }
 0x1bc   : > { %v1259_v10 = vmul.f32 %v1225_v17, %v2229_v12  ;;  %v1241_v33 = vmul.f32 %v2217_v49, %v1228_v19  ;;  %v1284_v48 = vadd.f32 %v1282_v37, %v1254_v38 }
 0x1bd   : > { %v1236_v22 = vadd.f32 %v1235_v28, %v1212_v13  ;;  %v1257_v14 = vadd.f32 %v1256_v30, %v1255_v29 }
 0x1be   : > { %v1260_v36 = vsub.f32 %v1258_v32, %v1259_v10  ;;  %v1316_v59 = vadd.f32 %v1314_v50, %v1284_v48 }
 0x1bf   : > { %v1242_v40 = vadd.f32 %v1241_v33, %v1236_v22  ;;  %v1267_v27 = vmul.f32 %v2225_v61, %v1257_v14  ;;  %v1285_v42 = vmul.f32 %v1257_v14, %v2231_v15  ;;  %v1289_v35 = vmul.f32 %v1257_v14, %v2229_v12 }
 0x1c0   : > { %v1286_v44 = vmul.f32 %v1260_v36, %v2229_v12  ;;  %v1288_v41 = vmul.f32 %v1260_v36, %v2231_v15  ;;  %v1273_v49 = vmul.f32 %v2221_v53, %v1260_v36  ;;  %v1346_v6 = vadd.f32 %v1344_v52, %v1316_v59 }
 0x1c1   : > { %v1268_v45 = vadd.f32 %v1267_v27, %v1242_v40 }
 0x1c2   : > { %v1287_v18 = vadd.f32 %v1286_v44, %v1285_v42  ;;  %v1290_v46 = vsub.f32 %v1288_v41, %v1289_v35 }
 0x1c3   : > { %v1274_v51 = vadd.f32 %v1273_v49, %v1268_v45 }
 0x1c4   : > { %v1297_v61 = vmul.f32 %v2251_v43, %v1287_v18  ;;  %v1320_v23 = vmul.f32 %v1290_v46, %v2231_v15  ;;  %v1321_v56 = vmul.f32 %v1287_v18, %v2229_v12  ;;  %v1317_v57 = vmul.f32 %v1287_v18, %v2231_v15 }
 0x1c5   : > { %v1318_v20 = vmul.f32 %v1290_v46, %v2229_v12  ;;  %v1303_v53 = vmul.f32 %v1301_v0, %v1290_v46  ;;  %v1350_v15 = vadd.f32 %v1349_v47, %v1347_v63  ;;  %v1351_v0 = vmul.f32 %v2173_v4, %v2173_v4 }
 0x1c6   : > { %v1298_v58 = vadd.f32 %v1297_v61, %v1274_v51  ;;  %v1322_v60 = vsub.f32 %v1320_v23, %v1321_v56 }
 0x1c7   : > { %v1319_v43 = vadd.f32 %v1318_v20, %v1317_v57  ;;  %v1353_v3 = vmul.f32 %v1350_v15, %v1346_v6 }
 0x1c8   : > { %v1304_v1 = vadd.f32 %v1303_v53, %v1298_v58  ;;  %v1335_v7 = vmul.f32 %v1333_v2, %v1322_v60 }
 0x1c9   : > { %v1329_v5 = vmul.f32 %v1327_v62, %v1319_v43 }
 0x1cb   : > { %v1330_v12 = vadd.f32 %v1329_v5, %v1304_v1 }
 0x1cd   : > { %v1336_v8 = vadd.f32 %v1335_v7, %v1330_v12 }
 0x1cf   : > { %v1352_v11 = vmul.f32 %v1351_v0, %v1336_v8 }
 0x1d1   : > { %v1354_v16 = vadd.f32 %v1353_v3, %v1352_v11 }
 0x1d3   : > { %1355 = vst [vmem:[%s318_s7] sm:$0x1] %v1354_v16 }
 0x1d4   : > { %1778 = shalt.err (!%p1775_p9)
}
 0x1d5   : > { %s1779_s4 = scalar_lea.hbm %s2293_s12, 16  ;;  %s1783_s17 = scalar_lea.hbm %s2348_s6, 32 }
 0x1d6   : > { %p1780_p1 = scmp.ne.s32.totalorder %s2293_s12, %s1779_s4  ;;  %p1784_p3 = scmp.lt.u32.totalorder %s2293_s12, %s2348_s6 }
 0x1d7   : > { %p1785_p13 = scmp.lt.u32.totalorder %s1783_s17, %s1779_s4  ;;  %p1787_p6 = scmp.lt.u32.totalorder %s1779_s4, %s2293_s12 }
 0x1d8   : > { %p1781_p2 = pnand %p1780_p1, %p2002_p10 }
 0x1d9   : > { %p1786_p4 = por %p1785_p13, %p1784_p3 }
 0x1da   : > { %p1782_p7 = pneg %p1781_p2 }
 0x1db   : > { %p1788_p8 = por %p1787_p6, %p1786_p4 }
 0x1dd   : > { %p1789_p12 = pnand %p1788_p8, %p1782_p7 }
 0x1df   : > { %1792 = shalt.err (!%p1789_p12)
}
 0x1e0   : > { %1597 = dma.vmem_to_hbm [thread:$0]  (%p2002_p10), %s2295_s9, 16, %s2293_s12, %s1357_s16  }
 0x1e1 PF: > { %s1382_s7 = sand.u32 1, %s1831_s21   ;;  %p2368_p11 = scmp.ne.s32.totalorder %s2357_s8, 0 }
 0x1e2   : > { %p2369_p0 = scmp.ge.s32.totalorder %s1851_s26, 2  ;;  %s1383_s14 = scalar_lea.sflag [#allocation5], %s1382_s7 }
 0x1e4   : > { %p1608_p5 = pnand %p2369_p0, %p2368_p11 }
 0x1e6   : > { %1826 = dma.done.wait (!%p1608_p5), %s1383_s14, 16  }
 0x1e7   : > { %1828 = vsyncadd (!%p1608_p5), %s1383_s14, 4294967280  ;;  %s23_s26 = sadd.s32 1, %s1851_s26   ;;  %s2370_s21 = smov %s1835_s22 }
 0x1e8   : > { %p20_p9 = scmp.ge.s32.totalorder %s23_s26, 4   ;;  %s2371_s22 = smov %s1839_s23 }
 0x1e9   : > { %s2372_s23 = smov %s2011_s20  ;;  %s2373_s24 = smov %s1847_s25 }
 0x1ea   : > { %s2374_s25 = smov %s2376_s13  ;;  %22 = sbr.rel (!%p20_p9) target bundleno = 9 (0x9), region = 100 }
 0x1f1   :  { %1387 = vsyncpa [#allocation4], 1 }
 0x1f2   :  { %1389 = vsyncpa [#allocation4 + $0x1], 1 }
 0x1f3   :  { %1390 = vsyncpa [#allocation7], 1 }
 0x1f4   :  { %1391 = vsyncpa [#allocation5], 1 }
 0x1f5   :  { %1393 = vsyncpa [#allocation5 + $0x1], 1 }

</bundles_post_ra>
